<compile_context>
chip_gen: v5e
topology: v5e:2x2
jax: 0.10.0
libtpu: 0.0.40
codegen_flags: <defaults>
</compile_context>

<pallas_src>
from copy import copy
from functools import partial

import jax
import jax.numpy as jnp
from jax.experimental import pallas as pl
from jax.experimental.pallas import tpu as pltpu

LANE = 128  # points per lane-row


def _cdiv(a, b):
    return -(-a // b)


def _round_up(a, m):
    return _cdiv(a, m) * m


# ------------------------------------------------------------------ kernel ---

def _fused_loss_kernel(pred_ref, gt_ref, sel_ref, l21_ref, sq_ref, *,
                       valid_rows, steps, need_mask):
    """One pass over a (TR, C*128) block of channel-interleaved points.

    Accumulates, into resident (8, 128) accumulators:
      l21_ref: sum over points of ||pred - gt||_2   (per-point L2 norm)
      sq_ref : sum over points of sum_c (pred - gt)^2
    Rows >= valid_rows (grid overrun past the array end) contribute exactly 0.
    """
    k = pl.program_id(1)

    @pl.when(k == 0)
    def _init():
        l21_ref[...] = jnp.zeros_like(l21_ref)
        sq_ref[...] = jnp.zeros_like(sq_ref)

    d = pred_ref[...].astype(jnp.float32) - gt_ref[...].astype(jnp.float32)
    d2 = d * d                                                 # (TR, C*128)

    # Channel de-interleave on the otherwise-idle MXU: the 0/1 selector sums the
    # C adjacent lanes of each point.  Manual hi/lo bf16 split keeps ~18 bits of
    # the f32 mantissa (operands exactly representable, f32 MXU accumulation) in
    # two cheap single passes, independent of the default f32 dot precision.
    hi = d2.astype(jnp.bfloat16)
    lo = (d2 - hi.astype(jnp.float32)).astype(jnp.bfloat16)
    sel = sel_ref[...]                                          # (C*128, 128) bf16
    norms2 = (jnp.dot(hi, sel, preferred_element_type=jnp.float32)
              + jnp.dot(lo, sel, preferred_element_type=jnp.float32))  # (TR, 128)
    norms2 = jnp.maximum(norms2, 0.0)

    tr = norms2.shape[0]
    if need_mask:  # static: only emitted when the grid overruns the array rows
        row = ((pl.program_id(0) * steps + k) * tr
               + jax.lax.broadcasted_iota(jnp.int32, norms2.shape, 0))
        norms2 = jnp.where(row < valid_rows, norms2, 0.0)

    folded = norms2.reshape(tr // 8, 8, LANE)      # fold rows onto the 8 sublanes
    sq_ref[...] += jnp.sum(folded, axis=0)         # VALU-only per-step accumulation
    # sqrt stays on the (TR,128) per-point plane only (EUP budget, cf. v7x).
    l21_ref[...] += jnp.sum(jnp.sqrt(folded), axis=0)


# ----------------------------------------------------------------- wrapper ---

def _choose_tiling(R, dtype):
    """Static tiling for R full 128-point rows."""
    itemsize = jnp.dtype(dtype).itemsize
    sub = 16 if itemsize < 4 else 8          # packed sublane tile for sub-32-bit dtypes
    max_tr = 3072 if itemsize < 4 else 2048  # ~2.25 MiB (bf16) / 3 MiB (f32) per block
    want_par = 2 if R >= 2 * sub else 1      # megacore partials (2 TCs on v7x)
    # Pick the number of grid blocks first, then round the block height up to the
    # sublane tile: padding is at most (sub-1) rows per block (<1% of DMA) instead
    # of a whole n_par*tr chunk (was ~24% wasted DMA for P=400k).
    n_blocks = want_par * _cdiv(R, want_par * max_tr)
    tr = _round_up(_cdiv(R, n_blocks), sub)
    n_blocks = _cdiv(R, tr)                  # keep every block with >= 1 valid row
    n_par = want_par if n_blocks % want_par == 0 else 1
    steps = n_blocks // n_par
    return n_par, steps, tr


def _make_selector(C):
    """(C*128, 128) 0/1 matrix: column k sums the C interleaved lanes of point k."""
    j = jnp.arange(C * LANE, dtype=jnp.int32)[:, None]
    k = jnp.arange(LANE, dtype=jnp.int32)[None, :]
    return (j // C == k).astype(jnp.bfloat16)


def _fused_pair(pred, gt):
    """One HBM pass over (pred, gt): (mean per-point L2 norm, mean squared error)."""
    assert pred.shape == gt.shape, (pred.shape, gt.shape)
    C = pred.shape[-1]
    P = 1
    for s in pred.shape[:-1]:
        P *= s
    pack = C * LANE

    flat_p = pred.reshape(-1)   # row-major flatten: layout-preserving, free
    flat_g = gt.reshape(-1)

    R = P // LANE               # full 128-point rows
    if R < 16:                  # degenerate tiny inputs: pure-jnp path below
        R = 0
    tail_n = P - R * LANE

    l21_sum = jnp.zeros((), jnp.float32)
    sq_sum = jnp.zeros((), jnp.float32)

    if R > 0:
        main_p = flat_p[:R * pack].reshape(R, pack)
        main_g = flat_g[:R * pack].reshape(R, pack)
        n_par, steps, tr = _choose_tiling(R, pred.dtype)
        need_mask = n_par * steps * tr > R

        sel = _make_selector(C)
        kernel = partial(_fused_loss_kernel, valid_rows=R, steps=steps,
                         need_mask=need_mask)
        point_spec = pl.BlockSpec((tr, pack), lambda p, k: (p * steps + k, 0))
        acc_spec = pl.BlockSpec((None, 8, LANE), lambda p, k: (p, 0, 0))

        l21_part, sq_part = pl.pallas_call(
            kernel,
            out_shape=(
                jax.ShapeDtypeStruct((n_par, 8, LANE), jnp.float32),
                jax.ShapeDtypeStruct((n_par, 8, LANE), jnp.float32),
            ),
            grid_spec=pltpu.PrefetchScalarGridSpec(
                num_scalar_prefetch=0,
                grid=(n_par, steps),
                in_specs=[point_spec, point_spec,
                          pl.BlockSpec((pack, LANE), lambda p, k: (0, 0))],
                out_specs=[acc_spec, acc_spec],   # resident accumulators
            ),
            compiler_params=pltpu.CompilerParams(
                # TODO(synk): verify on v7x that "parallel" shards axis 0 across
                # both TensorCores; switch to pltpu.CORE_PARALLEL if it does not.
                dimension_semantics=("parallel", "arbitrary"),
                vmem_limit_bytes=48 << 20,
            ),
        )(main_p, main_g, sel)

        # Tiny final cross-lane / cross-partial reduction outside the kernel.
        l21_sum = jnp.sum(l21_part)
        sq_sum = jnp.sum(sq_part)

    if tail_n > 0:
        tp = flat_p[R * pack:].reshape(tail_n, C).astype(jnp.float32)
        tg = flat_g[R * pack:].reshape(tail_n, C).astype(jnp.float32)
        dt = tp - tg
        dt2 = dt * dt
        l21_sum = l21_sum + jnp.sum(jnp.sqrt(jnp.sum(dt2, axis=-1)))
        sq_sum = sq_sum + jnp.sum(dt2)

    l21_mean = l21_sum / jnp.float32(P)      # mean per-point L2 norm
    mse = sq_sum / jnp.float32(P * C)        # mean squared error
    return l21_mean, mse


def _fused_losses(pred, gt, memo=None):
    """Per-forward memo: a composite criterion (e.g. L21 + a*MSE) evaluating both
    losses on the same (pred, gt) launches the fused kernel exactly once."""
    if memo is None:
        return _fused_pair(pred, gt)
    key = (id(pred), id(gt))
    out = memo.get(key)
    if out is None:
        out = _fused_pair(pred, gt)
        memo[key] = out
    return out


# ----------------------------------------------------- MultiLoss combinator ---

_FORWARD_JIT_CACHE = {}


class MultiLoss:
    """JAX port of slam3r MultiLoss: loss = MyLoss1() + 0.1*MyLoss2().

    The whole composite forward (all sub-losses, alpha scalings, chained adds and
    the reduction epilogues) runs as a single jitted XLA program, so the Pallas
    kernel output feeds the combinator without per-op host dispatch.
    """

    def __init__(self):
        self._alpha = 1
        self._loss2 = None

    def compute_loss(self, *args, **kwargs):
        raise NotImplementedError()

    def get_name(self):
        raise NotImplementedError()

    def __mul__(self, alpha):
        assert isinstance(alpha, (int, float))
        res = copy(self)
        res._alpha = alpha
        return res
    __rmul__ = __mul__

    def __add__(self, loss2):
        assert isinstance(loss2, MultiLoss)
        res = cur = copy(self)
        while cur._loss2 is not None:
            cur = cur._loss2
        cur._loss2 = loss2
        return res

    def __repr__(self):
        name = self.get_name()
        if self._alpha != 1:
            name = f'{self._alpha:g}*{name}'
        if self._loss2:
            name = f'{name} + {self._loss2}'
        return name

    # -- composite forward ----------------------------------------------------

    def _forward_impl(self, *args, _memo=None, **kwargs):
        if _memo is None:
            _memo = {}
        loss = self.compute_loss(*args, _memo=_memo, **kwargs)
        if isinstance(loss, tuple):
            loss, details = loss
        elif loss.ndim == 0:
            # Keep device scalars (no float()): avoids a host sync per sub-loss.
            details = {self.get_name(): loss}
        else:
            details = {}
        loss = loss * self._alpha
        if self._loss2 is not None:
            loss2, details2 = self._loss2._forward_impl(*args, _memo=_memo, **kwargs)
            loss = loss + loss2
            details = {**details, **details2}
        return loss, details

    def _structure_key(self):
        key, cur = [], self
        while cur is not None:
            key.append((type(cur), cur._alpha))
            cur = cur._loss2
        return tuple(key)

    def forward(self, *args, **kwargs):
        key = (id(self), self._structure_key())
        fn = _FORWARD_JIT_CACHE.get(key)
        if fn is None:
            fn = jax.jit(self._forward_impl)
            _FORWARD_JIT_CACHE[key] = fn
        return fn(*args, **kwargs)

    def __call__(self, *args, **kwargs):
        return self.forward(*args, **kwargs)


class L21Loss(MultiLoss):
    """Mean per-point L2 distance between pred and gt point maps (Pallas)."""
    # TODO(synk): if a custom VJP is ever added, use a safe-norm (epsilon) form,
    # since d/dx sqrt(x) is unbounded at x == 0 (exact matches / masked rows).

    def get_name(self):
        return "L21Loss"

    def compute_loss(self, pred, gt, _memo=None):
        return _fused_losses(pred, gt, _memo)[0]


class MSELoss(MultiLoss):
    """Mean squared error between pred and gt (Pallas)."""

    def get_name(self):
        return "MSELoss"

    def compute_loss(self, pred, gt, _memo=None):
        return _fused_losses(pred, gt, _memo)[1]


# ------------------------------------------------------------------- driver ---

if __name__ == "__main__":
    def ref_composite(pred, gt):
        d = pred.astype(jnp.float32) - gt.astype(jnp.float32)
        l21 = jnp.mean(jnp.sqrt(jnp.sum(d * d, axis=-1)))
        mse = jnp.mean(d * d)
        return l21 + 0.1 * mse

    # Combinator semantics identical to the PyTorch MultiLoss:
    criterion = L21Loss() + 0.1 * MSELoss()

    key = jax.random.PRNGKey(0)
    k1, k2, k3, k4 = jax.random.split(key, 4)

    # --- small f32 check ------------------------------------------------------
    B, N, C = 2, 1024, 3
    pred = jax.random.normal(k1, (B, N, C), dtype=jnp.float32)
    gt = jax.random.normal(k2, (B, N, C), dtype=jnp.float32)
    loss, details = criterion(pred, gt)
    loss = jax.block_until_ready(loss)
    assert jnp.allclose(loss, ref_composite(pred, gt), rtol=1e-5, atol=1e-5), loss
    assert set(details.keys()) == {"L21Loss", "MSELoss"}, details

    # --- moderate check: 2 megacore partials, overrun-row masking, <128-pt tail
    pred2 = jax.random.normal(k3, (1, 100_000, 3), dtype=jnp.float32)
    gt2 = jax.random.normal(k4, (1, 100_000, 3), dtype=jnp.float32)
    loss2, _ = criterion(pred2, gt2)
    loss2 = jax.block_until_ready(loss2)
    assert jnp.allclose(loss2, ref_composite(pred2, gt2), rtol=1e-4, atol=1e-4), loss2

    # --- bf16 inputs: DMA'd as bf16 (16-row packed blocks), upcast in-kernel ---
    pred_bf = pred.astype(jnp.bfloat16)
    gt_bf = gt.astype(jnp.bfloat16)
    loss_bf, _ = criterion(pred_bf, gt_bf)
    loss_bf = jax.block_until_ready(loss_bf)
    assert jnp.allclose(loss_bf, ref_composite(pred_bf, gt_bf),
                        rtol=1e-4, atol=1e-3), loss_bf

    print("KERNEL_OK")
</pallas_src>

<mosaic_0001>
module attributes {stable_mosaic.version = 11 : i64} {
  func.func @_fused_loss_kernel(%arg0: i32, %arg1: i32, %arg2: memref<8x384xf32, #tpu.memory_space<vmem>>, %arg3: memref<8x384xf32, #tpu.memory_space<vmem>>, %arg4: memref<384x128xbf16, #tpu.memory_space<vmem>>, %arg5: memref<1x8x128xf32, #tpu.memory_space<vmem>>, %arg6: memref<1x8x128xf32, #tpu.memory_space<vmem>>) attributes {dimension_semantics = [#tpu.dimension_semantics<parallel>, #tpu.dimension_semantics<arbitrary>], iteration_bounds = array<i64: 2, 1>, scalar_prefetch = 0 : i64, scratch_operands = 0 : i64, tpu.core_type = #tpu.core_type<tc>, window_params = [{transform_indices = @transform_0, window_bounds = array<i64: 8, 384>}, {transform_indices = @transform_1, window_bounds = array<i64: 8, 384>}, {pipeline_mode = #tpu.pipeline_mode<synchronous>, transform_indices = @transform_2, window_bounds = array<i64: 384, 128>}, {transform_indices = @transform_3, window_bounds = array<i64: 1, 8, 128>}, {transform_indices = @transform_4, window_bounds = array<i64: 1, 8, 128>}]} {
    %c0_i32 = arith.constant 0 : i32
    %0 = arith.cmpi eq, %arg1, %c0_i32 : i32
    %1 = arith.extui %0 : i1 to i32
    %c0_i32_0 = arith.constant 0 : i32
    %2 = arith.cmpi ne, %1, %c0_i32_0 : i32
    scf.if %2 {
      %cst_22 = arith.constant 0.000000e+00 : f32
      %33 = vector.broadcast %cst_22 : f32 to vector<8x128xf32>
      %c0_23 = arith.constant 0 : index
      %c0_24 = arith.constant 0 : index
      %c0_25 = arith.constant 0 : index
      %34 = vector.load %arg5[%c0_23, %c0_24, %c0_25] : memref<1x8x128xf32, #tpu.memory_space<vmem>>, vector<1x8x128xf32>
      %35 = vector.shape_cast %34 : vector<1x8x128xf32> to vector<8x128xf32>
      %36 = vector.shape_cast %33 : vector<8x128xf32> to vector<1x8x128xf32>
      tpu.vector_store %arg5[%c0_23, %c0_24, %c0_25], %36 {strides = array<i32>} : memref<1x8x128xf32, #tpu.memory_space<vmem>>, vector<1x8x128xf32>,
      %cst_26 = arith.constant 0.000000e+00 : f32
      %37 = vector.broadcast %cst_26 : f32 to vector<8x128xf32>
      %c0_27 = arith.constant 0 : index
      %c0_28 = arith.constant 0 : index
      %c0_29 = arith.constant 0 : index
      %38 = vector.load %arg6[%c0_27, %c0_28, %c0_29] : memref<1x8x128xf32, #tpu.memory_space<vmem>>, vector<1x8x128xf32>
      %39 = vector.shape_cast %38 : vector<1x8x128xf32> to vector<8x128xf32>
      %40 = vector.shape_cast %37 : vector<8x128xf32> to vector<1x8x128xf32>
      tpu.vector_store %arg6[%c0_27, %c0_28, %c0_29], %40 {strides = array<i32>} : memref<1x8x128xf32, #tpu.memory_space<vmem>>, vector<1x8x128xf32>,
    } else {
    }
    %c0 = arith.constant 0 : index
    %c0_1 = arith.constant 0 : index
    %3 = vector.load %arg2[%c0, %c0_1] : memref<8x384xf32, #tpu.memory_space<vmem>>, vector<8x384xf32>
    %c0_2 = arith.constant 0 : index
    %c0_3 = arith.constant 0 : index
    %4 = vector.load %arg3[%c0_2, %c0_3] : memref<8x384xf32, #tpu.memory_space<vmem>>, vector<8x384xf32>
    %5 = arith.subf %3, %4 : vector<8x384xf32>
    %6 = arith.mulf %5, %5 : vector<8x384xf32>
    %7 = arith.truncf %6 : vector<8x384xf32> to vector<8x384xbf16>
    %8 = arith.extf %7 : vector<8x384xbf16> to vector<8x384xf32>
    %9 = arith.subf %6, %8 : vector<8x384xf32>
    %10 = arith.truncf %9 : vector<8x384xf32> to vector<8x384xbf16>
    %c0_4 = arith.constant 0 : index
    %c0_5 = arith.constant 0 : index
    %11 = vector.load %arg4[%c0_4, %c0_5] : memref<384x128xbf16, #tpu.memory_space<vmem>>, vector<384x128xbf16>
    %cst = arith.constant dense<0.000000e+00> : vector<8x128xf32>
    %12 = tpu.matmul %7, %11, %cst {dimension_numbers = #tpu.dot_dimension_numbers<[1], [0], [0], [1], [0, 0, 1, 1], [], []>} : vector<8x384xbf16>, vector<384x128xbf16>, vector<8x128xf32> -> vector<8x128xf32>
    %cst_6 = arith.constant dense<0.000000e+00> : vector<8x128xf32>
    %13 = tpu.matmul %10, %11, %cst_6 {dimension_numbers = #tpu.dot_dimension_numbers<[1], [0], [0], [1], [0, 0, 1, 1], [], []>} : vector<8x384xbf16>, vector<384x128xbf16>, vector<8x128xf32> -> vector<8x128xf32>
    %14 = arith.addf %12, %13 : vector<8x128xf32>
    %cst_7 = arith.constant 0.000000e+00 : f32
    %15 = vector.broadcast %cst_7 : f32 to vector<8x128xf32>
    %16 = arith.maximumf %14, %15 : vector<8x128xf32>
    %17 = vector.shape_cast %16 : vector<8x128xf32> to vector<1x8x128xf32>
    %c0_8 = arith.constant 0 : index
    %c0_9 = arith.constant 0 : index
    %c0_10 = arith.constant 0 : index
    %18 = vector.load %arg6[%c0_8, %c0_9, %c0_10] : memref<1x8x128xf32, #tpu.memory_space<vmem>>, vector<1x8x128xf32>
    %19 = vector.shape_cast %18 : vector<1x8x128xf32> to vector<8x128xf32>
    %cst_11 = arith.constant dense<0.000000e+00> : vector<8x128xf32>
    %20 = vector.multi_reduction <add>, %17, %cst_11 [0] : vector<1x8x128xf32> to vector<8x128xf32>
    %21 = arith.addf %19, %20 : vector<8x128xf32>
    %c0_12 = arith.constant 0 : index
    %c0_13 = arith.constant 0 : index
    %c0_14 = arith.constant 0 : index
    %22 = vector.load %arg6[%c0_12, %c0_13, %c0_14] : memref<1x8x128xf32, #tpu.memory_space<vmem>>, vector<1x8x128xf32>
    %23 = vector.shape_cast %22 : vector<1x8x128xf32> to vector<8x128xf32>
    %24 = vector.shape_cast %21 : vector<8x128xf32> to vector<1x8x128xf32>
    tpu.vector_store %arg6[%c0_12, %c0_13, %c0_14], %24 {strides = array<i32>} : memref<1x8x128xf32, #tpu.memory_space<vmem>>, vector<1x8x128xf32>,
    %c0_15 = arith.constant 0 : index
    %c0_16 = arith.constant 0 : index
    %c0_17 = arith.constant 0 : index
    %25 = vector.load %arg5[%c0_15, %c0_16, %c0_17] : memref<1x8x128xf32, #tpu.memory_space<vmem>>, vector<1x8x128xf32>
    %26 = vector.shape_cast %25 : vector<1x8x128xf32> to vector<8x128xf32>
    %27 = math.sqrt %17 : vector<1x8x128xf32>
    %cst_18 = arith.constant dense<0.000000e+00> : vector<8x128xf32>
    %28 = vector.multi_reduction <add>, %27, %cst_18 [0] : vector<1x8x128xf32> to vector<8x128xf32>
    %29 = arith.addf %26, %28 : vector<8x128xf32>
    %c0_19 = arith.constant 0 : index
    %c0_20 = arith.constant 0 : index
    %c0_21 = arith.constant 0 : index
    %30 = vector.load %arg5[%c0_19, %c0_20, %c0_21] : memref<1x8x128xf32, #tpu.memory_space<vmem>>, vector<1x8x128xf32>
    %31 = vector.shape_cast %30 : vector<1x8x128xf32> to vector<8x128xf32>
    %32 = vector.shape_cast %29 : vector<8x128xf32> to vector<1x8x128xf32>
    tpu.vector_store %arg5[%c0_19, %c0_20, %c0_21], %32 {strides = array<i32>} : memref<1x8x128xf32, #tpu.memory_space<vmem>>, vector<1x8x128xf32>,
    return
  }
  func.func @transform_0(%arg0: i32, %arg1: i32) -> (i32, i32) {
    %c1_i32 = arith.constant 1 : i32
    %0 = arith.muli %arg0, %c1_i32 : i32
    %1 = arith.addi %0, %arg1 : i32
    %c0_i32 = arith.constant 0 : i32
    %c0_i32_0 = arith.constant 0 : i32
    return %1, %c0_i32 : i32, i32
  }
  func.func @transform_1(%arg0: i32, %arg1: i32) -> (i32, i32) {
    %c1_i32 = arith.constant 1 : i32
    %0 = arith.muli %arg0, %c1_i32 : i32
    %1 = arith.addi %0, %arg1 : i32
    %c0_i32 = arith.constant 0 : i32
    %c0_i32_0 = arith.constant 0 : i32
    return %1, %c0_i32 : i32, i32
  }
  func.func @transform_2(%arg0: i32, %arg1: i32) -> (i32, i32) {
    %c0_i32 = arith.constant 0 : i32
    %c0_i32_0 = arith.constant 0 : i32
    %c0_i32_1 = arith.constant 0 : i32
    return %c0_i32, %c0_i32_0 : i32, i32
  }
  func.func @transform_3(%arg0: i32, %arg1: i32) -> (i32, i32, i32) {
    %c0_i32 = arith.constant 0 : i32
    %c0_i32_0 = arith.constant 0 : i32
    %c0_i32_1 = arith.constant 0 : i32
    return %arg0, %c0_i32, %c0_i32_0 : i32, i32, i32
  }
  func.func @transform_4(%arg0: i32, %arg1: i32) -> (i32, i32, i32) {
    %c0_i32 = arith.constant 0 : i32
    %c0_i32_0 = arith.constant 0 : i32
    %c0_i32_1 = arith.constant 0 : i32
    return %arg0, %c0_i32, %c0_i32_0 : i32, i32, i32
  }
}

</mosaic_0001>

<bundles_post_ra>
// kernel: _forward_impl.1
= control target key start
LH: loop header
LB: loop body
LE: loop exit
PB: predicated region body
PF: predicated region fallthrough
CT: control target
= control target key end

     0   :  { %s896_s15 = smov 0   ;;  %s898_s16 = smov 0   ;;  %s1035_s0 = inlined_call_operand.vmem [shape: f32[16,384], index: 0, kind: input, shape index: {}]   ;;  %s1036_s1 = inlined_call_operand.vmem [shape: f32[16,384], index: 1, kind: input, shape index: {}]   ;;  %s1037_s2 = inlined_call_operand.vmem [shape: bf16[384,128], index: 2, kind: input, shape index: {}]   ;;  %s1038_s3 = inlined_call_operand.vmem [shape: f32[2,8,128], index: 3, kind: output, shape index: {0}]   ;;  %s1039_s4 = inlined_call_operand.vmem [shape: f32[2,8,128], index: 4, kind: output, shape index: {1}]  }
   0x1   :  { %s900_s17 = smov 0  }
   0x2 LB: > { %s27_s18 = sadd.s32 1, %s865_s16  ;;  %p692_p0 = scmp.ge.s32.totalorder %s869_s17, 1  ;;  %s869_s17 = sphi %s900_s17, %s15_s17   ;;  %s865_s16 = sphi %s898_s16, %s1041_s16   ;;  %s861_s15 = sphi %s896_s15, %s1040_s15  }
   0x3   : > { %p29_p1 = scmp.ge.s32.totalorder %s27_s18, 2  ;;  %p195_p2 = scmp.lt.s32.totalorder %s869_s17, 3 }
   0x5   : > { %s1043_s18 = smov (%p29_p1, %s27_s18), 0  ;;  %p196_p3 = pnand %p692_p0, %p195_p2 }
   0x6   : > { %p232_p4 = scmp.lt.s32.totalorder (!%p196_p3), %s861_s15, 1 }
   0x7   : > { %199 = sbr.rel (%p196_p3) target bundleno = 230 (0xe6), region = 32 }
   0xc   : > { %v802_v0 = vld [vmem:[%s1037_s2 + $0x38] sm:$0xff]  ;;  %v801_v2 = vld [vmem:[%s1037_s2 + $0x30] sm:$0xff]  ;;  %s1045_s15 = smov (!%p232_p4, %s861_s15), 1  ;;  %v800_v6 = vld [vmem:[%s1037_s2 + $0x28] sm:$0xff] }
   0xd   : > { %v920_v1 = vld [vmem:[%s1037_s2 + $0x78] sm:$0xff]  ;;  %474 = vmatpush.bf16.msra.mxu0 %v802_v0  ;;  %v929_v3 = vld [vmem:[%s1037_s2 + $0x70] sm:$0xff]  ;;  %524 = vmatpush.bf16.msra.mxu3 %v802_v0  ;;  %s819_s5 = smul.u32 24, %s1045_s15  ;;  %v952_v7 = vld [vmem:[%s1037_s2 + $0x68] sm:$0xff]  ;;  %s695_s30 = sshll.u32 %s1045_s15, 3 }
   0xe   : > { %487 = vmatpush.bf16.msra.mxu1 %v920_v1  ;;  %v934_v4 = vld [vmem:[%s1037_s2 + $0xb8] sm:$0xff]  ;;  %v942_v5 = vld [vmem:[%s1037_s2 + $0xb0] sm:$0xff]  ;;  %v963_v8 = vld [vmem:[%s1037_s2 + $0xa8] sm:$0xff]  ;;  %s252_s7 = scalar_lea.vmem %s1039_s4, %s695_s30  ;;  %s248_s9 = scalar_lea.vmem %s1038_s3, %s695_s30 }
   0xf   : > { %500 = vmatpush.bf16.msra.mxu2 %v934_v4  ;;  %s236_s12 = scalar_lea.vmem %s1035_s0, %s819_s5  ;;  %s243_s19 = scalar_lea.vmem %s1036_s1, %s819_s5  ;;  %v799_v17 = vld [vmem:[%s1037_s2 + $0x20] sm:$0xff]  ;;  %v798_v23 = vld [vmem:[%s1037_s2 + $0x18] sm:$0xff]  ;;  %v797_v28 = vld [vmem:[%s1037_s2 + $0x10] sm:$0xff] }
  0x10   : > { %v259_v9 = vld [vmem:[%s236_s12] sm:$0xff]  ;;  %v260_v10 = vld [vmem:[%s236_s12 + $0x8] sm:$0xff]  ;;  %v261_v15 = vld [vmem:[%s236_s12 + $0x10] sm:$0xff] }
  0x11   : > { %475 = vmatpush.bf16.msra.mxu0 %v801_v2  ;;  %525 = vmatpush.bf16.msra.mxu3 %v801_v2  ;;  %v262_v11 = vld [vmem:[%s243_s19] sm:$0xff]  ;;  %v263_v12 = vld [vmem:[%s243_s19 + $0x8] sm:$0xff]  ;;  %v264_v16 = vld [vmem:[%s243_s19 + $0x10] sm:$0xff] }
  0x12   : > { %488 = vmatpush.bf16.msra.mxu1 %v929_v3  ;;  %v265_v13 = vsub.f32 %v259_v9, %v262_v11  ;;  %v266_v14 = vsub.f32 %v260_v10, %v263_v12  ;;  %v807_v18 = vld [vmem:[%s1037_s2 + $0x60] sm:$0xff]  ;;  %v267_v20 = vsub.f32 %v261_v15, %v264_v16  ;;  %v806_v24 = vld [vmem:[%s1037_s2 + $0x58] sm:$0xff]  ;;  %v805_v29 = vld [vmem:[%s1037_s2 + $0x50] sm:$0xff] }
  0x13   : > { %501 = vmatpush.bf16.msra.mxu2 %v942_v5  ;;  %v815_v19 = vld [vmem:[%s1037_s2 + $0xa0] sm:$0xff]  ;;  %v814_v25 = vld [vmem:[%s1037_s2 + $0x98] sm:$0xff]  ;;  %v813_v30 = vld [vmem:[%s1037_s2 + $0x90] sm:$0xff] }
  0x14   : > { %v268_v21 = vmul.f32 %v265_v13, %v265_v13  ;;  %v269_v22 = vmul.f32 %v266_v14, %v266_v14  ;;  %v270_v26 = vmul.f32 %v267_v20, %v267_v20  ;;  %v796_v34 = vld [vmem:[%s1037_s2 + $0x8] sm:$0xff]  ;;  %v795_v40 = vld [vmem:[%s1037_s2] sm:$0xff] }
  0x15   : > { %476 = vmatpush.bf16.msra.mxu0 %v800_v6  ;;  %526 = vmatpush.bf16.msra.mxu3 %v800_v6  ;;  %v804_v35 = vld [vmem:[%s1037_s2 + $0x48] sm:$0xff]  ;;  %v803_v41 = vld [vmem:[%s1037_s2 + $0x40] sm:$0xff] }
  0x16   : > { %489 = vmatpush.bf16.msra.mxu1 %v952_v7  ;;  %v271_v27 = vpack.c.bf16 %v269_v22, %v268_v21  ;;  %v272_v31 = vpack.c.bf16 %v270_v26, %v270_v26  ;;  %v812_v36 = vld [vmem:[%s1037_s2 + $0x88] sm:$0xff]  ;;  %v811_v42 = vld [vmem:[%s1037_s2 + $0x80] sm:$0xff] }
  0x17   : > { %502 = vmatpush.bf16.msra.mxu2 %v963_v8 }
  0x18   : > { %v273_v32 = vunpack.c.l.bf16 %v271_v27  ;;  %v274_v33 = vunpack.c.h.bf16 %v271_v27  ;;  %v275_v37 = vunpack.c.l.bf16 %v272_v31  ;;  %v515_v44 = vunpack.c.l.b16 %v271_v27 }
  0x19   : > { %477 = vmatpush.bf16.msra.mxu0 %v799_v17  ;;  %527 = vmatpush.bf16.msra.mxu3 %v799_v17  ;;  %v516_v49 = vunpack.c.h.b16 %v271_v27  ;;  %v517_v50 = vunpack.c.l.b16 %v272_v31 }
  0x1a   : > { %490 = vmatpush.bf16.msra.mxu1 %v807_v18  ;;  %v276_v38 = vsub.f32 %v268_v21, %v273_v32  ;;  %v277_v39 = vsub.f32 %v269_v22, %v274_v33  ;;  %v278_v43 = vsub.f32 %v270_v26, %v275_v37  ;;  %v518_v48 = vpack.c.b16 %v515_v44, %v515_v44 }
  0x1b   : > { %503 = vmatpush.bf16.msra.mxu2 %v815_v19  ;;  %v519_v51 = vpack.c.b16 %v516_v49, %v516_v49  ;;  %v520_v52 = vpack.c.b16 %v517_v50, %v517_v50 }
  0x1c   : > { %v279_v45 = vpack.c.bf16 %v276_v38, %v276_v38  ;;  %v280_v46 = vpack.c.bf16 %v277_v39, %v277_v39  ;;  %v281_v47 = vpack.c.bf16 %v278_v43, %v278_v43 }
  0x1d   : > { %478 = vmatpush.bf16.msra.mxu0 %v798_v23  ;;  %528 = vmatpush.bf16.msra.mxu3 %v798_v23 }
  0x1e   : > { %491 = vmatpush.bf16.msra.mxu1 %v806_v24 }
  0x1f   : > { %504 = vmatpush.bf16.msra.mxu2 %v814_v25 }
  0x21   : > { %479 = vmatpush.bf16.msra.mxu0 %v797_v28  ;;  %529 = vmatpush.bf16.msra.mxu3 %v797_v28 }
  0x22   : > { %492 = vmatpush.bf16.msra.mxu1 %v805_v29 }
  0x23   : > { %505 = vmatpush.bf16.msra.mxu2 %v813_v30 }
  0x25   : > { %480 = vmatpush.bf16.msra.mxu0 %v796_v34  ;;  %530 = vmatpush.bf16.msra.mxu3 %v796_v34 }
  0x26   : > { %493 = vmatpush.bf16.msra.mxu1 %v804_v35 }
  0x27   : > { %506 = vmatpush.bf16.msra.mxu2 %v812_v36 }
  0x29   : > { %481 = vmatpush.bf16.msra.mxu0 %v795_v40  ;;  %531 = vmatpush.bf16.msra.mxu3 %v795_v40 }
  0x2a   : > { %494 = vmatpush.bf16.msra.mxu1 %v803_v41 }
  0x2b   : > { %507 = vmatpush.bf16.msra.mxu2 %v811_v42 }
  0x2c   : > { %482 = vmatmul.bf16.vlgmr.msra.gmra.mxu0 %v279_v45  ;;  %532 = vmatmul.bf16.vlgmr.msra.gmra.mxu3 %v518_v48 }
  0x2d   : > { %537 = vmatpush.bf16.msrb.mxu0 %v920_v1  ;;  %495 = vmatmul.bf16.vlgmr.msra.gmra.mxu1 %v280_v46 }
  0x2e   : > { %550 = vmatpush.bf16.msrb.mxu1 %v934_v4  ;;  %508 = vmatmul.bf16.vlgmr.msra.gmra.mxu2 %v281_v47 }
  0x31   : > { %538 = vmatpush.bf16.msrb.mxu0 %v929_v3 }
  0x32   : > { %551 = vmatpush.bf16.msrb.mxu1 %v942_v5 }
  0x35   : > { %539 = vmatpush.bf16.msrb.mxu0 %v952_v7 }
  0x36   : > { %552 = vmatpush.bf16.msrb.mxu1 %v963_v8 }
  0x39   : > { %540 = vmatpush.bf16.msrb.mxu0 %v807_v18 }
  0x3a   : > { %553 = vmatpush.bf16.msrb.mxu1 %v815_v19 }
  0x3d   : > { %541 = vmatpush.bf16.msrb.mxu0 %v806_v24 }
  0x3e   : > { %554 = vmatpush.bf16.msrb.mxu1 %v814_v25 }
  0x41   : > { %542 = vmatpush.bf16.msrb.mxu0 %v805_v29 }
  0x42   : > { %555 = vmatpush.bf16.msrb.mxu1 %v813_v30 }
  0x45   : > { %543 = vmatpush.bf16.msrb.mxu0 %v804_v35 }
  0x46   : > { %556 = vmatpush.bf16.msrb.mxu1 %v812_v36 }
  0x49   : > { %544 = vmatpush.bf16.msrb.mxu0 %v803_v41 }
  0x4a   : > { %557 = vmatpush.bf16.msrb.mxu1 %v811_v42 }
  0x4c   : > { %545 = vmatmul.bf16.vlgmr.msrb.gmra.mxu0 %v519_v51 }
  0x4d   : > { %558 = vmatmul.bf16.vlgmr.msrb.gmra.mxu1 %v520_v52 }
  0xa9   : > { %v483_v53 = vpop.f32.mrf.mxu0 }
  0xaa   : > { %v496_v54 = vpop.f32.mrf.mxu1 }
  0xab   : > { %v497_v61 = vadd.f32 %v496_v54, %v483_v53 }
  0xaf   : > { %v533_v58 = vpop.f32.mrf.mxu3 }
  0xb1   : > { %v485_v55 = vpop.f32.mrf.mxu0  ;;  %v509_v57 = vpop.f32.mrf.mxu2 }
  0xb2   : > { %v498_v56 = vpop.f32.mrf.mxu1  ;;  %v510_v62 = vadd.f32 %v509_v57, %v497_v61 }
  0xb4   : > { %v534_v63 = vadd.f32 %v533_v58, %v510_v62 }
  0xb7   : > { %v535_v60 = vpop.f32.mrf.mxu3 }
  0xb9   : > { %v511_v59 = vpop.f32.mrf.mxu2 }
  0xc9   : > { %v546_v0 = vpop.f32.mrf.mxu0 }
  0xca   : > { %v559_v1 = vpop.f32.mrf.mxu1  ;;  %v547_v2 = vadd.f32 %v546_v0, %v534_v63 }
  0xcc   : > { %v560_v3 = vadd.f32 %v559_v1, %v547_v2 }
  0xce   : > { %v563_v4 = vmax.f32 %v560_v3, 0.0 }
  0xd0   : > { %845 = vrsqrt.f32 %v563_v4  ;;  %567 = vst [vmem:[%s252_s7] sm:$0xff] %v563_v4  ;;  %vm576_vm0 = vcmp.eq.f32.partialorder %v563_v4, inf  ;;  %v579_v14 = vand.u32 2147483648, %v563_v4  ;;  %vm578_vm1 = vcmp.eq.f32.partialorder %v563_v4, 0.0 }
  0xd1   : > { %v548_v5 = vpop.f32.mrf.mxu0 }
  0xd2   : > { %v561_v6 = vpop.f32.mrf.mxu1 }
  0xd6   : > { %v846_v7 = vpop.eup %845 }
  0xd7   : > { %v570_v8 = vmul.f32 %v846_v7, %v563_v4 }
  0xd9   : > { %v571_v9 = vmul.f32 %v846_v7, %v570_v8 }
  0xdb   : > { %v572_v10 = vmul.f32 0.5, %v571_v9 }
  0xdd   : > { %v573_v11 = vsub.f32 1.5, %v572_v10 }
  0xdf   : > { %v574_v12 = vmul.f32 %v846_v7, %v573_v11 }
  0xe1   : > { %v575_v13 = vmul.f32 %v574_v12, %v563_v4 }
  0xe3   : > { %v577_v15 = vsel %vm576_vm0, %v563_v4, %v575_v13 }
  0xe4   : > { %v580_v16 = vsel %vm578_vm1, %v579_v14, %v577_v15 }
  0xe5   : > { %583 = vst [vmem:[%s248_s9] sm:$0xff] %v580_v16 }
  0xe6 PF: > { %s15_s17 = sadd.s32 1, %s869_s17   ;;  %s1040_s15 = smov %s865_s16 }
  0xe7   : > { %p12_p5 = scmp.ge.s32.totalorder %s15_s17, 4   ;;  %s1041_s16 = smov %s1043_s18 }
  0xe9   :  { %14 = sbr.rel (!%p12_p5) target bundleno = 2 (0x2), region = 81 }

</bundles_post_ra>
